<compile_context>
chip_gen: v7x
topology: tpu7x:2x2x1
jax: 0.10.0
libtpu: 0.0.40
codegen_flags: <defaults>
</compile_context>

<pallas_src>
import jax
import jax.numpy as jnp
from jax.experimental import pallas as pl
from jax.experimental.pallas import tpu as pltpu


# ----------------------------------------------------------------------------
# helpers
# ----------------------------------------------------------------------------
def _round_up(x: int, m: int) -> int:
    return ((x + m - 1) // m) * m


def _pick_tiles():
    """Per-generation (TL, TM, vmem_limit_bytes).  v7x has half the VMEM of
    v5e/v6e, so use smaller tiles and a smaller scoped-VMEM request there."""
    try:
        vmem = pltpu.get_tpu_info().vmem_capacity_bytes
    except Exception:
        vmem = 64 * 1024 * 1024
    if vmem >= 96 * 1024 * 1024:           # v5e / v6e: 128 MiB VMEM
        return 512, 1024, 64 * 1024 * 1024
    return 256, 512, 32 * 1024 * 1024      # v7x: 64 MiB VMEM


# ----------------------------------------------------------------------------
# Pallas kernel: tiled relative positional logits
#   q_ref : (1, TL, D)  bf16 query rows for one (batch, head)
#   e_ref : (1, TM, D)  bf16 relative embeddings for that head (stays resident
#                       across the innermost L axis)
#   o_ref : (1, TL, TM) fp32 positional logits tile (lane-dense: TM % 128 == 0)
# ----------------------------------------------------------------------------
def _rel_pos_logits_kernel(q_ref, e_ref, o_ref):
    q = q_ref[0]
    e = e_ref[0]
    o_ref[0] = jax.lax.dot_general(
        q, e, dimension_numbers=(((1,), (1,)), ((), ())),
        preferred_element_type=jnp.float32,
    ).astype(o_ref.dtype)


def rel_pos_logits(q_gld: jax.Array, emb_hmd: jax.Array,
                   *, compute_dtype=jnp.bfloat16,
                   out_dtype=jnp.float32) -> jax.Array:
    """q_gld: (G, L, D) with G = batch*heads (b-major, h-minor);
    emb_hmd: (HE, M, D) with HE == num_heads or 1 (shared).
    Returns (G, L, M) logits in out_dtype; row g uses embedding head g % HE."""
    G, L, D = q_gld.shape
    HE, M, De = emb_hmd.shape
    assert D == De

    tl_target, tm_target, vmem_limit = _pick_tiles()
    TL = min(tl_target, _round_up(L, 16))    # 16: bf16 sublane packing
    TM = min(tm_target, _round_up(M, 128))   # lane-dense output tiles
    L_pad = _round_up(L, TL)
    M_pad = _round_up(M, TM)

    q = q_gld.astype(compute_dtype)
    e = emb_hmd.astype(compute_dtype)
    if L_pad != L:
        q = jnp.pad(q, ((0, 0), (0, L_pad - L), (0, 0)))
    if M_pad != M:
        e = jnp.pad(e, ((0, 0), (0, M_pad - M), (0, 0)))

    if HE == 1:
        e_index = lambda g, m, l: (0, m, 0)
    else:
        e_index = lambda g, m, l: (g % HE, m, 0)

    out = pl.pallas_call(
        _rel_pos_logits_kernel,
        out_shape=jax.ShapeDtypeStruct((G, L_pad, M_pad), out_dtype),
        grid_spec=pltpu.PrefetchScalarGridSpec(
            num_scalar_prefetch=0,
            grid=(G, M_pad // TM, L_pad // TL),   # L innermost -> emb resident
            in_specs=[
                pl.BlockSpec((1, TL, D), lambda g, m, l: (g, l, 0)),
                pl.BlockSpec((1, TM, D), e_index),
            ],
            out_specs=pl.BlockSpec((1, TL, TM), lambda g, m, l: (g, l, m)),
        ),
        compiler_params=pltpu.CompilerParams(
            dimension_semantics=("parallel", "parallel", "parallel"),
            vmem_limit_bytes=vmem_limit,
        ),
    )(q, e)

    if L_pad != L or M_pad != M:
        out = out[:, :L, :M]
    return out


# ----------------------------------------------------------------------------
# Module port (parameters initialized deterministically in-script)
# ----------------------------------------------------------------------------
class LearnedRelativePositionalEmbedding:
    def __init__(self, max_relative_pos, num_heads, embedding_dim,
                 unmasked=False, heads_share_embeddings=False,
                 add_to_values=False, *, key):
        self.max_relative_pos = max_relative_pos
        self.num_heads = num_heads
        self.embedding_dim = embedding_dim
        self.unmasked = unmasked
        self.heads_share_embeddings = heads_share_embeddings
        self.add_to_values = add_to_values

        num_embeddings = 2 * max_relative_pos - 1 if unmasked else max_relative_pos
        shape = ([num_embeddings, embedding_dim, 1] if heads_share_embeddings
                 else [num_heads, num_embeddings, embedding_dim, 1])
        if add_to_values:
            shape[-1] = 2
        std = embedding_dim ** (-0.5)
        self.embeddings = std * jax.random.normal(key, tuple(shape), jnp.float32)

        # jit the whole forward so the pad/slice/re-indexing glue fuses with the
        # pallas_call instead of dispatching eagerly.
        self._jit_forward = jax.jit(self._forward)

    # --- forward -------------------------------------------------------------
    def __call__(self, query, saved_state=None, sentence_position_index=None):
        if saved_state is not None or sentence_position_index is not None:
            # TODO(synk): decoder-step / sentence-position paths not implemented.
            raise NotImplementedError(
                "saved_state / sentence_position_index paths are not ported")
        return self._jit_forward(self.embeddings, query)

    def _forward(self, embeddings, query):
        length = query.shape[0]
        used = self._get_embeddings_for_query(embeddings, length)
        values_embeddings = used[..., 1] if self.add_to_values else None
        logits = self._calculate_positional_logits(query, used[..., 0])
        logits = self._relative_to_absolute_indexing(logits)
        return logits, values_embeddings

    # --- embedding table pad/slice (matches PyTorch semantics) ---------------
    def get_embeddings_for_query(self, length):
        return self._get_embeddings_for_query(self.embeddings, length)

    def _get_embeddings_for_query(self, embeddings, length):
        pad_length = max(length - self.max_relative_pos, 0)
        start_pos = max(self.max_relative_pos - length, 0)
        ax = embeddings.ndim - 3  # the num_embeddings axis
        pad_cfg = [(0, 0)] * embeddings.ndim
        if self.unmasked:
            pad_cfg[ax] = (pad_length, pad_length)
            n = 2 * length - 1
        else:
            pad_cfg[ax] = (pad_length, 0)
            n = length
        padded = jnp.pad(embeddings, pad_cfg)
        return jax.lax.slice_in_dim(padded, start_pos, start_pos + n, axis=ax)

    # --- positional logits via the Pallas kernel ------------------------------
    def _calculate_positional_logits(self, query, rel_emb):
        L = query.shape[0]
        D = self.embedding_dim
        BH = query.shape[1]
        if self.heads_share_embeddings:
            # 'lbd,md->lbm' : every (b,h) row uses the single shared table.
            q = jnp.transpose(query, (1, 0, 2))                   # (BH, L, D)
            e = rel_emb[None]                                     # (1, M, D)
        else:
            # 'lbhd,hmd->lbhm' : regroup query per (b,h); head of row g = g % H.
            H = self.num_heads
            B = BH // H
            q = query.reshape(L, B, H, D)
            q = jnp.transpose(q, (1, 2, 0, 3)).reshape(B * H, L, D)  # (BH, L, D)
            e = rel_emb                                              # (H, M, D)
        # (BH, L, M) fp32 — already in the layout the re-indexing consumes.
        return rel_pos_logits(q, e)

    # --- relative -> absolute re-indexing, transpose-free ---------------------
    def _relative_to_absolute_indexing(self, x):
        # x: (BH, L, M) with M = L (masked) or 2L-1 (unmasked)
        bh, length, _ = x.shape
        if self.unmasked:
            x = jnp.pad(x, ((0, 0), (0, 0), (0, 1)))          # (BH, L, 2L)
            x = x.reshape(bh, length * 2 * length)
            x = jnp.pad(x, ((0, 0), (0, length - 1)))
            x = x.reshape(bh, length + 1, 2 * length - 1)
            return x[:, :length, length - 1:]
        else:
            x = jnp.pad(x, ((0, 0), (0, 0), (1, 0)))          # (BH, L, L+1)
            x = x.reshape(bh, length + 1, length)
            return x[:, 1:, :]


# ----------------------------------------------------------------------------
# Pure-JAX reference (mirrors the torch code, with the same bf16 input rounding
# as the kernel so the comparison is apples-to-apples)
# ----------------------------------------------------------------------------
def reference_forward(mod: LearnedRelativePositionalEmbedding, query):
    L = query.shape[0]
    used = mod.get_embeddings_for_query(L)
    used_k = used[..., 0]
    q32 = query.astype(jnp.bfloat16).astype(jnp.float32)
    e32 = used_k.astype(jnp.bfloat16).astype(jnp.float32)
    if mod.heads_share_embeddings:
        logits = jnp.einsum('lbd,md->lbm', q32, e32,
                            precision=jax.lax.Precision.HIGHEST)
    else:
        qh = q32.reshape(L, -1, mod.num_heads, mod.embedding_dim)
        logits = jnp.einsum('lbhd,hmd->lbhm', qh, e32,
                            precision=jax.lax.Precision.HIGHEST)
        logits = logits.reshape(L, -1, logits.shape[-1])
    # torch-style re-indexing on (L, BH, M)
    length, bh, _ = logits.shape
    if mod.unmasked:
        x = jnp.pad(logits, ((0, 0), (0, 0), (0, 1)))
        x = jnp.transpose(x, (1, 0, 2)).reshape(bh, length * 2 * length)
        x = jnp.pad(x, ((0, 0), (0, length - 1)))
        x = x.reshape(bh, length + 1, 2 * length - 1)
        out = x[:, :length, length - 1:]
    else:
        x = jnp.pad(logits, ((0, 0), (0, 0), (1, 0)))
        x = jnp.transpose(x, (1, 0, 2)).reshape(bh, length + 1, length)
        out = x[:, 1:, :]
    vals = used[..., 1] if mod.add_to_values else None
    return out, vals


if __name__ == "__main__":
    key = jax.random.PRNGKey(0)
    k1, k2, k3, k4 = jax.random.split(key, 4)

    max_relative_pos = 16
    num_heads = 4
    embedding_dim = 32
    length = 8
    batch = 2

    # --- config A: masked (decoder-style), per-head embeddings ---------------
    mod_a = LearnedRelativePositionalEmbedding(
        max_relative_pos, num_heads, embedding_dim,
        unmasked=False, heads_share_embeddings=False, add_to_values=False,
        key=k1)
    q_a = jax.random.normal(k2, (length, batch * num_heads, embedding_dim),
                            jnp.float32)
    logits_a, vals_a = mod_a(q_a)
    logits_a = jax.block_until_ready(logits_a)
    assert logits_a.shape == (batch * num_heads, length, length), logits_a.shape
    assert vals_a is None
    ref_a, _ = reference_forward(mod_a, q_a)
    assert jnp.allclose(logits_a, ref_a, atol=1e-3, rtol=1e-3), "A: mismatch"

    # --- config B: unmasked (encoder-style), shared embeddings, add_to_values -
    mod_b = LearnedRelativePositionalEmbedding(
        max_relative_pos, num_heads, embedding_dim,
        unmasked=True, heads_share_embeddings=True, add_to_values=True,
        key=k3)
    q_b = jax.random.normal(k4, (length, batch * num_heads, embedding_dim),
                            jnp.float32)
    logits_b, vals_b = mod_b(q_b)
    logits_b = jax.block_until_ready(logits_b)
    vals_b = jax.block_until_ready(vals_b)
    assert logits_b.shape == (batch * num_heads, length, length), logits_b.shape
    ref_b, ref_vals_b = reference_forward(mod_b, q_b)
    assert jnp.allclose(logits_b, ref_b, atol=1e-3, rtol=1e-3), "B: mismatch"
    assert jnp.allclose(vals_b, ref_vals_b), "B: values-embedding mismatch"

    print("KERNEL_OK")
</pallas_src>

<mosaic_0001>
module attributes {stable_mosaic.version = 11 : i64} {
  func.func @_rel_pos_logits_kernel(%arg0: i32, %arg1: i32, %arg2: i32, %arg3: memref<1x16x32xbf16, #tpu.memory_space<vmem>>, %arg4: memref<1x128x32xbf16, #tpu.memory_space<vmem>>, %arg5: memref<1x16x128xf32, #tpu.memory_space<vmem>>) attributes {dimension_semantics = [#tpu.dimension_semantics<parallel>, #tpu.dimension_semantics<parallel>, #tpu.dimension_semantics<parallel>], iteration_bounds = array<i64: 8, 1, 1>, scalar_prefetch = 0 : i64, scratch_operands = 0 : i64, tpu.core_type = #tpu.core_type<tc>, window_params = [{transform_indices = @transform_0, window_bounds = array<i64: 1, 16, 32>}, {transform_indices = @transform_1, window_bounds = array<i64: 1, 128, 32>}, {transform_indices = @transform_2, window_bounds = array<i64: 1, 16, 128>}]} {
    %c0 = arith.constant 0 : index
    %c0_0 = arith.constant 0 : index
    %c0_1 = arith.constant 0 : index
    %0 = vector.load %arg3[%c0, %c0_0, %c0_1] : memref<1x16x32xbf16, #tpu.memory_space<vmem>>, vector<1x16x32xbf16>
    %1 = vector.shape_cast %0 : vector<1x16x32xbf16> to vector<16x32xbf16>
    %c0_2 = arith.constant 0 : index
    %c0_3 = arith.constant 0 : index
    %c0_4 = arith.constant 0 : index
    %2 = vector.load %arg4[%c0_2, %c0_3, %c0_4] : memref<1x128x32xbf16, #tpu.memory_space<vmem>>, vector<1x128x32xbf16>
    %3 = vector.shape_cast %2 : vector<1x128x32xbf16> to vector<128x32xbf16>
    %cst = arith.constant dense<0.000000e+00> : vector<16x128xf32>
    %4 = tpu.matmul %1, %3, %cst {dimension_numbers = #tpu.dot_dimension_numbers<[1], [1], [0], [0], [0, 0, 1, 0], [], []>} : vector<16x32xbf16>, vector<128x32xbf16>, vector<16x128xf32> -> vector<16x128xf32>
    %c0_5 = arith.constant 0 : index
    %c0_6 = arith.constant 0 : index
    %c0_7 = arith.constant 0 : index
    %5 = vector.load %arg5[%c0_5, %c0_6, %c0_7] : memref<1x16x128xf32, #tpu.memory_space<vmem>>, vector<1x16x128xf32>
    %6 = vector.shape_cast %5 : vector<1x16x128xf32> to vector<16x128xf32>
    %7 = vector.shape_cast %4 : vector<16x128xf32> to vector<1x16x128xf32>
    tpu.vector_store %arg5[%c0_5, %c0_6, %c0_7], %7 {strides = array<i32>} : memref<1x16x128xf32, #tpu.memory_space<vmem>>, vector<1x16x128xf32>,
    return
  }
  func.func @transform_0(%arg0: i32, %arg1: i32, %arg2: i32) -> (i32, i32, i32) {
    %c0_i32 = arith.constant 0 : i32
    %c0_i32_0 = arith.constant 0 : i32
    return %arg0, %arg2, %c0_i32 : i32, i32, i32
  }
  func.func @transform_1(%arg0: i32, %arg1: i32, %arg2: i32) -> (i32, i32, i32) {
    %c4_i32 = arith.constant 4 : i32
    %c0_i32 = arith.constant 0 : i32
    %0 = arith.cmpi eq, %c4_i32, %c0_i32 : i32
    %c1_i32 = arith.constant 1 : i32
    %1 = arith.select %0, %c1_i32, %c4_i32 : i32
    %2 = arith.remsi %arg0, %1 : i32
    %c0_i32_0 = arith.constant 0 : i32
    %3 = arith.cmpi ne, %2, %c0_i32_0 : i32
    %c0_i32_1 = arith.constant 0 : i32
    %4 = arith.cmpi slt, %2, %c0_i32_1 : i32
    %c0_i32_2 = arith.constant 0 : i32
    %5 = arith.cmpi slt, %1, %c0_i32_2 : i32
    %6 = arith.xori %4, %5 : i1
    %7 = arith.andi %6, %3 : i1
    %8 = arith.addi %2, %1 : i32
    %9 = arith.select %7, %8, %2 : i32
    %c0_i32_3 = arith.constant 0 : i32
    %c0_i32_4 = arith.constant 0 : i32
    return %9, %arg1, %c0_i32_3 : i32, i32, i32
  }
  func.func @transform_2(%arg0: i32, %arg1: i32, %arg2: i32) -> (i32, i32, i32) {
    %c0_i32 = arith.constant 0 : i32
    return %arg0, %arg2, %arg1 : i32, i32, i32
  }
}

</mosaic_0001>

<bundles_post_ra>
// kernel: _forward.1
= control target key start
LH: loop header
LB: loop body
LE: loop exit
PB: predicated region body
PF: predicated region fallthrough
CT: control target
= control target key end

     0   :  { %s711_s9 = smov 0   ;;  %s713_s10 = smov 0   ;;  %s763_s0 = inlined_call_operand.vmem [shape: bf16[8,16,32], index: 0, kind: input, shape index: {}]   ;;  %s764_s1 = inlined_call_operand.vmem [shape: bf16[4,128,32], index: 1, kind: input, shape index: {}]   ;;  %s765_s2 = inlined_call_operand.vmem [shape: f32[8,16,128], index: 2, kind: output, shape index: {}]  }
   0x1   :  { %s715_s11 = smov 0  }
   0x2 LB: > { %s31_s12 = sadd.s32 1, %s688_s10  ;;  %p581_p0 = scmp.ge.s32.totalorder %s692_s11, 1  ;;  %s692_s11 = sphi %s715_s11, %s12_s11   ;;  %s688_s10 = sphi %s713_s10, %s767_s10   ;;  %s684_s9 = sphi %s711_s9, %s766_s9  }
   0x3   : > { %p33_p1 = scmp.ge.s32.totalorder %s31_s12, 8  ;;  %p207_p2 = scmp.lt.s32.totalorder %s692_s11, 9 }
   0x5   : > { %s769_s12 = smov (%p33_p1, %s31_s12), 0  ;;  %p208_p3 = pnand %p581_p0, %p207_p2 }
   0x6   : > { %p271_p4 = scmp.lt.s32.totalorder (!%p208_p3), %s684_s9, 0  ;;  %s272_s13 = ssub.s32 (!%p208_p3), 0, %s684_s9  ;;  %v694_v0 = vmov (!%p208_p3), 0.0   ;;  %vm695_vm0 = vmmov (!%p208_p3), 0   ;;  %vm382_vm1 = vcmask (!%p208_p3), 261120  }
   0x7   : > { %211 = sbr.rel (%p208_p3) target bundleno = 303 (0x12f), region = 28  ;;  %615 = vmatprep.subr.bf16.mxu0 (!%p208_p3), %v694_v0  ;;  %s584_s14 = smin.u32 (!%p208_p3), %s684_s9, %s272_s13  ;;  %631 = vmatprep.mubr.msk.bf16.mxu0 (!%p208_p3), %vm695_vm0, %v694_v0 }
   0x8   : > { %p262_p5 = scmp.lt.s32.totalorder (!%p208_p3), %s684_s9, 7  ;;  %s274_s15 = sand.u32 (!%p208_p3), 3, %s584_s14  }
   0x9   : > { %s275_s16 = ssub.s32 (!%p208_p3), 0, %s274_s15 }
   0xe   : > { %s771_s16 = smov (!%p271_p4, %s275_s16), %s274_s15  ;;  %s773_s9 = smov (!%p262_p5, %s684_s9), 7 }
   0xf   : > { %p586_p6 = scmp.lt.s32.totalorder %s771_s16, 0  ;;  %s281_s17 = sadd.s32 4, %s771_s16 }
  0x10   : > { %s603_s18 = sshll.u32 %s773_s9, 3  ;;  %s605_s26 = sshll.u32 %s773_s9, 4 }
  0x11   : > { %s775_s17 = smov (!%p586_p6, %s281_s17), %s771_s16  ;;  %s735_s21 = scalar_lea.vmem %s763_s0, %s603_s18 }
  0x12   : > { %p284_p7 = scmp.lt.s32.totalorder %s775_s17, 3  ;;  %v669_v17 = vld [vmem:[%s735_s21] sm:$0xff]   ;;  %s316_s29 = scalar_lea.vmem %s765_s2, %s605_s26 }
  0x14   : > { %s777_s17 = smov (!%p284_p7, %s775_s17), 3 }
  0x15   : > { %s604_s22 = sshll.u32 %s777_s17, 6 }
  0x16   : > { %s291_s25 = scalar_lea.vmem %s764_s1, %s604_s22 }
  0x17   : > { %v661_v1 = vld [vmem:[%s291_s25] sm:$0xff]   ;;  %v662_v3 = vld [vmem:[%s291_s25 + $0x8] sm:$0xff]   ;;  %v663_v5 = vld [vmem:[%s291_s25 + $0x10] sm:$0xff]  }
  0x18   : > { %v387_v2 = vsel %vm382_vm1, %v661_v1, 0  ;;  %v390_v4 = vsel %vm382_vm1, %v662_v3, 0  ;;  %v393_v6 = vsel %vm382_vm1, %v663_v5, 0  ;;  %v664_v7 = vld [vmem:[%s291_s25 + $0x18] sm:$0xff]   ;;  %v665_v9 = vld [vmem:[%s291_s25 + $0x20] sm:$0xff]   ;;  %v666_v11 = vld [vmem:[%s291_s25 + $0x28] sm:$0xff]  }
  0x19   : > { %616 = vmatpush3.bf16.xpose.msra.mxu0 %v387_v2  ;;  %v396_v8 = vsel %vm382_vm1, %v664_v7, 0  ;;  %v399_v10 = vsel %vm382_vm1, %v665_v9, 0  ;;  %v402_v12 = vsel %vm382_vm1, %v666_v11, 0  ;;  %v667_v13 = vld [vmem:[%s291_s25 + $0x30] sm:$0xff]   ;;  %v668_v15 = vld [vmem:[%s291_s25 + $0x38] sm:$0xff]  }
  0x1a   : > { %617 = vmatprep.subr.bf16.mxu0 %v694_v0  ;;  %v405_v14 = vsel %vm382_vm1, %v667_v13, 0  ;;  %v408_v16 = vsel %vm382_vm1, %v668_v15, 0 }
  0x21   : > { %618 = vmatpush3.bf16.xpose.msra.mxu0 %v390_v4 }
  0x22   : > { %619 = vmatprep.subr.bf16.mxu0 %v694_v0 }
  0x29   : > { %620 = vmatpush3.bf16.xpose.msra.mxu0 %v393_v6 }
  0x2a   : > { %621 = vmatprep.subr.bf16.mxu0 %v694_v0 }
  0x31   : > { %622 = vmatpush3.bf16.xpose.msra.mxu0 %v396_v8 }
  0x32   : > { %623 = vmatprep.subr.bf16.mxu0 %v694_v0 }
  0x39   : > { %624 = vmatpush3.bf16.xpose.msra.mxu0 %v399_v10 }
  0x3a   : > { %625 = vmatprep.subr.bf16.mxu0 %v694_v0 }
  0x41   : > { %626 = vmatpush3.bf16.xpose.msra.mxu0 %v402_v12 }
  0x42   : > { %627 = vmatprep.subr.bf16.mxu0 %v694_v0 }
  0x49   : > { %628 = vmatpush3.bf16.xpose.msra.mxu0 %v405_v14 }
  0x4a   : > { %629 = vmatprep.subr.bf16.mxu0 %v694_v0 }
  0x51   : > { %630 = vmatpush3.bf16.xpose.msra.mxu0 %v408_v16 }
  0x58   : > { %632 = vmatmul.mubr.msk.bf16.vlgmr.msra.gmra.mrb[0].mxu0 %vm382_vm1, %v669_v17 }
 0x12b   : > { %v444_v18 = vpop.f32.mrb[0].mxu0 }
 0x12c   : > { %451 = vst [vmem:[%s316_s29] sm:$0xff] %v444_v18  ;;  %v633_v19 = vpop.f32.mrb[1].mxu0 }
 0x12d   : > { %v447_v20 = vpop.f32.mrb[2].mxu0 }
 0x12e   : > { %452 = vst [vmem:[%s316_s29 + $0x8] sm:$0xff] %v447_v20  ;;  %v634_v21 = vpop.f32.mrb[3].mxu0 }
 0x12f PF: > { %s12_s11 = sadd.s32 1, %s692_s11   ;;  %s766_s9 = smov %s688_s10 }
 0x130   : > { %p9_p8 = scmp.ge.s32.totalorder %s12_s11, 10   ;;  %s767_s10 = smov %s769_s12 }
 0x132   :  { %11 = sbr.rel (!%p9_p8) target bundleno = 2 (0x2), region = 61 }

</bundles_post_ra>
